<compile_context>
chip_gen: v5e
topology: v5e:2x2
jax: 0.10.0
libtpu: 0.0.40
codegen_flags: <defaults>
</compile_context>

<pallas_src>
import math

import jax
import jax.numpy as jnp
from jax.experimental import pallas as pl
from jax.experimental.pallas import tpu as pltpu


# ---------------------------------------------------------------------------
# Stage 1: fused global avg + max pooling over the spatial axis.
# ---------------------------------------------------------------------------
def _make_pool_kernel(*, thw, nk_total, nk_per, rem, ragged, has_phantom,
                      macc_dtype, chunked):
    if not chunked:
        # Single spatial tile per batch block: reduce it directly.  The
        # cross-lane reduce runs once per output row block, so there is no
        # per-tile XLU overhead to amortize and no scratch is needed.
        def kernel(x_ref, psum_ref, pmax_ref):
            x = x_ref[...].astype(jnp.float32)            # (TB, C, HW)
            psum_ref[...] = jnp.sum(x, axis=-1)
            pmax_ref[...] = jnp.max(x, axis=-1)

        return kernel

    nchunks = thw // 128

    def kernel(x_ref, psum_ref, pmax_ref, sacc_ref, macc_ref):
        sp = pl.program_id(0)
        k = pl.program_id(2)
        k_glob = sp * nk_per + k

        @pl.when(k == 0)
        def _init():
            sacc_ref[...] = jnp.zeros_like(sacc_ref)
            macc_ref[...] = jnp.full_like(macc_ref, -jnp.inf)

        def accumulate(last):
            # Per-tile partial reduction over lane-aligned 128-wide chunks
            # (pure VPU adds/maxes).  The (TB, C, 128) running partial is
            # folded into the VMEM accumulators once per tile; the cross-lane
            # reduce is deferred to the finalize step.
            s = None
            m = None
            for j in range(nchunks):
                lo = j * 128
                if last and lo >= rem:
                    break                                   # fully OOB chunk
                chunk = x_ref[:, :, lo:lo + 128]
                cs = chunk.astype(jnp.float32)
                cm = chunk.astype(macc_dtype)
                if last and lo + 128 > rem:                 # ragged tail chunk
                    lane = jax.lax.broadcasted_iota(jnp.int32, chunk.shape, 2)
                    valid = lane < (rem - lo)
                    cs = jnp.where(valid, cs, jnp.array(0.0, jnp.float32))
                    cm = jnp.where(valid, cm, jnp.array(-jnp.inf, macc_dtype))
                if s is None:
                    s, m = cs, cm
                else:
                    s = s + cs
                    m = jnp.maximum(m, cm)
            sacc_ref[...] = sacc_ref[...] + s
            macc_ref[...] = jnp.maximum(macc_ref[...], m)

        if ragged:
            # Masking only on the globally-last spatial tile.
            @pl.when(k_glob < nk_total - 1)
            def _full():
                accumulate(False)

            @pl.when(k_glob == nk_total - 1)
            def _last():
                accumulate(True)
        elif has_phantom:
            @pl.when(k_glob < nk_total)
            def _full():
                accumulate(False)
        else:
            accumulate(False)

        @pl.when(k == nk_per - 1)
        def _finalize():
            psum_ref[...] = jnp.sum(sacc_ref[...], axis=-1)
            pmax_ref[...] = jnp.max(macc_ref[...].astype(jnp.float32), axis=-1)

    return kernel


# ---------------------------------------------------------------------------
# Stage 2: combine slab partials + bottleneck MLP + sigmoid (tiny).
# ---------------------------------------------------------------------------
def _make_mlp_kernel(hw):
    inv_hw = 1.0 / float(hw)

    def kernel(psum_ref, pmax_ref, w1t_ref, w2t_ref, o_ref):
        avg = jnp.sum(psum_ref[...], axis=0) * inv_hw       # (B, C) f32
        mx = jnp.max(pmax_ref[...], axis=0)                 # (B, C) f32

        def fc(v):
            h = jnp.maximum(
                jnp.dot(v, w1t_ref[...], preferred_element_type=jnp.float32),
                0.0)
            return jnp.dot(h, w2t_ref[...], preferred_element_type=jnp.float32)

        o_ref[...] = jax.nn.sigmoid(fc(avg) + fc(mx)).astype(o_ref.dtype)

    return kernel


def _vmem_capacity_bytes():
    try:
        info = pltpu.get_tpu_info()
        for attr in ("vmem_capacity_bytes", "vmem_bytes", "vmem_size_bytes"):
            v = getattr(info, attr, None)
            if v:
                return int(v)
    except Exception:
        pass
    return 64 * 1024 * 1024   # conservative fallback (v7x per-TensorCore VMEM)


def mam_forward(x, w1, w2, *, spatial_block=None, interpret=False):
    """x: (B, C, H, W); w1: (mid, C) [conv1 weight squeezed]; w2: (C, mid)."""
    B, C, H, W = x.shape
    mid = w1.shape[0]
    assert w1.shape == (mid, C) and w2.shape == (C, mid)
    HW = H * W
    itemsize = jnp.dtype(x.dtype).itemsize

    x3 = x.reshape(B, C, HW)                      # free reshape, native dtype
    w1t = jnp.asarray(w1, jnp.float32).T          # (C, mid)
    w2t = jnp.asarray(w2, jnp.float32).T          # (mid, C)

    # --- batch tiling: small fixed TB so spatial tiles (DMA runs) stay long ---
    TB = 8 if B >= 8 else B
    nb = pl.cdiv(B, TB)
    rows = TB * C

    # bf16 max accumulation is exact; keep it packed, cast once at finalize.
    macc_dtype = x.dtype if jnp.issubdtype(x.dtype, jnp.floating) else jnp.float32
    acc_bytes = rows * 128 * (4 + jnp.dtype(macc_dtype).itemsize)

    # --- generation-aware VMEM budgeting ---
    vmem_cap = _vmem_capacity_bytes()
    vmem_limit = int(min(vmem_cap * 3 // 4, 96 * 1024 * 1024))
    misc = 2 * 1024 * 1024
    per_buf = max(1 * 1024 * 1024,
                  min(16 * 1024 * 1024, (vmem_limit - acc_bytes - misc) // 3))

    MAX_CHUNKS = 64                       # cap on unrolled 128-lane chunks/tile
    DIRECT_MAX_BYTES = 4 * 1024 * 1024    # f32 temp cap for single-tile path

    if spatial_block is not None:         # test/override hook
        lane_cap = max(128, (min(spatial_block, max(HW, 128)) // 128) * 128)
    else:
        lane_cap = max(128, min((per_buf // (rows * itemsize)) // 128 * 128,
                                MAX_CHUNKS * 128))

    direct = (HW <= 128) or (spatial_block is None and HW <= lane_cap
                             and rows * HW * 4 <= DIRECT_MAX_BYTES)
    if direct:
        THW, nk = HW, 1
    else:
        cap = min(lane_cap, MAX_CHUNKS * 128)
        nk0 = max(2, pl.cdiv(HW, cap))
        THW = pl.cdiv(pl.cdiv(HW, nk0), 128) * 128   # balanced, multiple of 128
        nk = pl.cdiv(HW, THW)

    rem = HW - (nk - 1) * THW
    ragged = (nk >= 2) and (rem != THW)

    # Dual-TensorCore slab split of the spatial range when batch gives no
    # parallel axis (typical small/inference batches).
    nsp = 2 if (nb == 1 and nk >= 2) else 1
    nk_per = pl.cdiv(nk, nsp)
    has_phantom = nsp * nk_per > nk

    kernel = _make_pool_kernel(thw=THW, nk_total=nk, nk_per=nk_per, rem=rem,
                               ragged=ragged, has_phantom=has_phantom,
                               macc_dtype=macc_dtype, chunked=(nk >= 2))
    scratch = []
    if nk >= 2:
        scratch = [pltpu.VMEM((TB, C, 128), jnp.float32),   # running sum partial
                   pltpu.VMEM((TB, C, 128), macc_dtype)]    # running max partial

    x_map = lambda sp, b, k: (b, 0, jnp.minimum(sp * nk_per + k, nk - 1))
    o_map = lambda sp, b, k: (sp, b, 0)

    psum, pmax = pl.pallas_call(
        kernel,
        out_shape=(jax.ShapeDtypeStruct((nsp, B, C), jnp.float32),
                   jax.ShapeDtypeStruct((nsp, B, C), jnp.float32)),
        grid_spec=pltpu.PrefetchScalarGridSpec(
            num_scalar_prefetch=0,
            grid=(nsp, nb, nk_per),
            in_specs=[pl.BlockSpec((TB, C, THW), x_map)],
            out_specs=[pl.BlockSpec((None, TB, C), o_map),
                       pl.BlockSpec((None, TB, C), o_map)],
            scratch_shapes=scratch),
        compiler_params=pltpu.CompilerParams(
            dimension_semantics=("parallel", "parallel", "arbitrary"),
            vmem_limit_bytes=vmem_limit),
        interpret=interpret,
    )(x3)

    # Stage 2: combine partials + tiny bottleneck MLP + sigmoid.
    out2d = pl.pallas_call(
        _make_mlp_kernel(HW),
        out_shape=jax.ShapeDtypeStruct((B, C), x.dtype),
        grid_spec=pltpu.PrefetchScalarGridSpec(
            num_scalar_prefetch=0,
            grid=(1,),
            in_specs=[pl.BlockSpec((nsp, B, C), lambda i: (0, 0, 0)),
                      pl.BlockSpec((nsp, B, C), lambda i: (0, 0, 0)),
                      pl.BlockSpec((C, mid), lambda i: (0, 0)),
                      pl.BlockSpec((mid, C), lambda i: (0, 0))],
            out_specs=pl.BlockSpec((B, C), lambda i: (0, 0))),
        compiler_params=pltpu.CompilerParams(
            dimension_semantics=("arbitrary",)),
        interpret=interpret,
    )(psum, pmax, w1t, w2t)

    # Match PyTorch output shape (B, C, 1, 1)
    return out2d.reshape(B, C, 1, 1)


def mam_reference(x, w1, w2):
    """Pure-JAX reference mirroring the PyTorch module (computed in f32)."""
    B, C, H, W = x.shape
    xf = x.reshape(B, C, H * W).astype(jnp.float32)
    avg = jnp.mean(xf, axis=-1)
    mx = jnp.max(xf, axis=-1)

    def fc(v):
        h = jnp.maximum(v @ w1.T, 0.0)
        return h @ w2.T

    return jax.nn.sigmoid(fc(avg) + fc(mx)).reshape(B, C, 1, 1)


if __name__ == "__main__":
    key = jax.random.PRNGKey(0)

    def init_params(k, C, ratio=16):
        mid = max(1, C // ratio)
        k1, k2 = jax.random.split(k)
        b1 = 1.0 / math.sqrt(C)
        b2 = 1.0 / math.sqrt(mid)
        w1 = jax.random.uniform(k1, (mid, C), jnp.float32, -b1, b1)
        w2 = jax.random.uniform(k2, (C, mid), jnp.float32, -b2, b2)
        return w1, w2

    cases = [
        # (B,  C,  H,  W,  dtype,        spatial_block, atol)
        (2,  32, 16, 16, jnp.float32,  None, 1e-5),   # single-tile direct path
        (2,  32, 16, 16, jnp.float32,  128,  1e-5),   # 2 tiles, dual-slab split
        (2,  32, 18, 18, jnp.float32,  128,  1e-5),   # ragged tail + phantom tile
        (4,  32, 16, 16, jnp.bfloat16, 128,  2e-2),   # bf16 input, bf16 max acc
        (10, 32, 16, 16, jnp.float32,  128,  1e-5),   # ragged batch block (TB=8)
    ]

    for idx, (B, C, H, W, dtype, sb, atol) in enumerate(cases):
        kk = jax.random.fold_in(key, idx)
        kx, kw = jax.random.split(kk)
        x = jax.random.normal(kx, (B, C, H, W), jnp.float32).astype(dtype)
        w1, w2 = init_params(kw, C)

        out = mam_forward(x, w1, w2, spatial_block=sb)
        jax.block_until_ready(out)

        ref = mam_reference(x, w1, w2)
        assert out.shape == (B, C, 1, 1)
        err = float(jnp.max(jnp.abs(out.astype(jnp.float32) -
                                    ref.astype(jnp.float32))))
        assert err <= atol, f"case {idx}: max abs err {err} > {atol}"

    print("KERNEL_OK")
</pallas_src>

<mosaic_0001>
module attributes {stable_mosaic.version = 11 : i64} {
  func.func @kernel(%arg0: i32, %arg1: i32, %arg2: i32, %arg3: memref<2x32x256xf32, #tpu.memory_space<vmem>>, %arg4: memref<1x2x32xf32, #tpu.memory_space<vmem>>, %arg5: memref<1x2x32xf32, #tpu.memory_space<vmem>>) attributes {dimension_semantics = [#tpu.dimension_semantics<parallel>, #tpu.dimension_semantics<parallel>, #tpu.dimension_semantics<arbitrary>], iteration_bounds = array<i64: 1, 1, 1>, scalar_prefetch = 0 : i64, scratch_operands = 0 : i64, tpu.core_type = #tpu.core_type<tc>, window_params = [{transform_indices = @transform_0, window_bounds = array<i64: 2, 32, 256>}, {transform_indices = @transform_1, window_bounds = array<i64: 1, 2, 32>}, {transform_indices = @transform_2, window_bounds = array<i64: 1, 2, 32>}]} {
    %c0 = arith.constant 0 : index
    %c0_0 = arith.constant 0 : index
    %c0_1 = arith.constant 0 : index
    %0 = vector.load %arg3[%c0, %c0_0, %c0_1] : memref<2x32x256xf32, #tpu.memory_space<vmem>>, vector<2x32x256xf32>
    %cst = arith.constant dense<0.000000e+00> : vector<2x32xf32>
    %1 = vector.multi_reduction <add>, %0, %cst [2] : vector<2x32x256xf32> to vector<2x32xf32>
    %c0_2 = arith.constant 0 : index
    %c0_3 = arith.constant 0 : index
    %c0_4 = arith.constant 0 : index
    %2 = vector.load %arg4[%c0_2, %c0_3, %c0_4] : memref<1x2x32xf32, #tpu.memory_space<vmem>>, vector<1x2x32xf32>
    %3 = vector.shape_cast %2 : vector<1x2x32xf32> to vector<2x32xf32>
    %4 = vector.shape_cast %1 : vector<2x32xf32> to vector<1x2x32xf32>
    tpu.vector_store %arg4[%c0_2, %c0_3, %c0_4], %4 {strides = array<i32>} : memref<1x2x32xf32, #tpu.memory_space<vmem>>, vector<1x2x32xf32>,
    %cst_5 = arith.constant dense<0xFF800000> : vector<2x32xf32>
    %5 = vector.multi_reduction <maximumf>, %0, %cst_5 [2] : vector<2x32x256xf32> to vector<2x32xf32>
    %c0_6 = arith.constant 0 : index
    %c0_7 = arith.constant 0 : index
    %c0_8 = arith.constant 0 : index
    %6 = vector.load %arg5[%c0_6, %c0_7, %c0_8] : memref<1x2x32xf32, #tpu.memory_space<vmem>>, vector<1x2x32xf32>
    %7 = vector.shape_cast %6 : vector<1x2x32xf32> to vector<2x32xf32>
    %8 = vector.shape_cast %5 : vector<2x32xf32> to vector<1x2x32xf32>
    tpu.vector_store %arg5[%c0_6, %c0_7, %c0_8], %8 {strides = array<i32>} : memref<1x2x32xf32, #tpu.memory_space<vmem>>, vector<1x2x32xf32>,
    return
  }
  func.func @transform_0(%arg0: i32, %arg1: i32, %arg2: i32) -> (i32, i32, i32) {
    %c1_i32 = arith.constant 1 : i32
    %0 = arith.muli %arg0, %c1_i32 : i32
    %1 = arith.addi %0, %arg2 : i32
    %c0_i32 = arith.constant 0 : i32
    %2 = arith.minsi %1, %c0_i32 : i32
    %c0_i32_0 = arith.constant 0 : i32
    %c0_i32_1 = arith.constant 0 : i32
    return %arg1, %c0_i32_0, %2 : i32, i32, i32
  }
  func.func @transform_1(%arg0: i32, %arg1: i32, %arg2: i32) -> (i32, i32, i32) {
    %c0_i32 = arith.constant 0 : i32
    %c0_i32_0 = arith.constant 0 : i32
    return %arg0, %arg1, %c0_i32 : i32, i32, i32
  }
  func.func @transform_2(%arg0: i32, %arg1: i32, %arg2: i32) -> (i32, i32, i32) {
    %c0_i32 = arith.constant 0 : i32
    %c0_i32_0 = arith.constant 0 : i32
    return %arg0, %arg1, %c0_i32 : i32, i32, i32
  }
}

</mosaic_0001>

<bundles_post_ra>
// kernel: tpu_custom_call.1
= control target key start
LH: loop header
LB: loop body
LE: loop exit
PB: predicated region body
PF: predicated region fallthrough
CT: control target
= control target key end

     0   :  { %8 = vsyncpa [#allocation3], 0  ;;  %s325_s0 = inlined_call_operand.hbm [shape: f32[2,32,256], index: 0, kind: input, shape index: {}]   ;;  %s326_s1 = inlined_call_operand.hbm [shape: f32[1,2,32], index: 1, kind: output, shape index: {0}]   ;;  %s327_s2 = inlined_call_operand.hbm [shape: f32[1,2,32], index: 2, kind: output, shape index: {1}]  }
   0x1   :  { %9 = vsyncpa [#allocation4], 0 }
   0x2   :  { %10 = vsyncpa [#allocation7], 0  ;;  %s21_s11 = sshll.u32 %s325_s0, 4  ;;  %s280_s12 = smov [#allocation2]   ;;  %s22_s11 = int_to_ptr.hbm [resolvable:$true] %s21_s11 }
   0x3   :  { %s23_s13 = sshll.u32 %s280_s12, 4  ;;  %s281_s14 = smov 256   ;;  %s24_s13 = int_to_ptr.vmem [resolvable:$true] %s23_s13 }
   0x4   :  { %s282_s15 = smov 16  }
   0x5   :  { %29 = dma.hbm_to_vmem [thread:$0]  %s22_s11, 2048, %s24_s13, [#allocation3], %s281_s14, %s281_s14, %s282_s15  }
   0x6   :  { %274 = dma.done.wait [#allocation3], 2048  }
   0x7   :  { %275 = vsyncadd [#allocation3], 4294965248  ;;  %v46_v0 = vld [vmem:[#allocation2 + $0x40] sm:$0xff]  ;;  %v47_v1 = vld [vmem:[#allocation2 + $0x48] sm:$0xff]  ;;  %v86_v41 = vlaneseq  ;;  %vm91_vm0 = vcmask 130112   ;;  %vm95_vm1 = vcmask 195712  }
   0x8   :  { %v38_v2 = vld [vmem:[#allocation2] sm:$0xff]  ;;  %v66_v3 = vadd.f32 %v47_v1, %v46_v0  ;;  %v39_v4 = vld [vmem:[#allocation2 + $0x8] sm:$0xff]  ;;  %v48_v7 = vld [vmem:[#allocation2 + $0x50] sm:$0xff]  ;;  %v125_v18 = vmax.f32 %v46_v0, %v47_v1  ;;  %vm99_vm2 = vcmask 261312   ;;  %s283_s0 = smov [#allocation5]   ;;  %s169_s19 = sshll.u32 %s326_s1, 4  ;;  %s170_s19 = int_to_ptr.hbm [resolvable:$true] %s169_s19 }
   0x9   :  { %v113_v5 = vmax.f32 %v38_v2, %v39_v4  ;;  %v54_v6 = vadd.f32 %v39_v4, %v38_v2  ;;  %v49_v8 = vld [vmem:[#allocation2 + $0x58] sm:$0xff]  ;;  %v40_v9 = vld [vmem:[#allocation2 + $0x10] sm:$0xff]  ;;  %v42_v14 = vld [vmem:[#allocation2 + $0x20] sm:$0xff]  ;;  %v87_v42 = vand.u32 127, %v86_v41  ;;  %s167_s16 = sshll.u32 %s283_s0, 4  ;;  %vm108_vm3 = vcmask 1041409   ;;  %s168_s16 = int_to_ptr.vmem [resolvable:$true] %s167_s16 }
   0xa   :  { %67 = vadd.xlane.f32.xlu1 %v66_v3  ;;  %v41_v10 = vld [vmem:[#allocation2 + $0x18] sm:$0xff]  ;;  %v69_v11 = vadd.f32 %v49_v8, %v48_v7  ;;  %v43_v15 = vld [vmem:[#allocation2 + $0x28] sm:$0xff]  ;;  %v128_v16 = vmax.f32 %v48_v7, %v49_v8  ;;  %v50_v19 = vld [vmem:[#allocation2 + $0x60] sm:$0xff]  ;;  %vm111_vm4 = vcmask 254976   ;;  %s284_s1 = smov [#allocation6]   ;;  %s180_s23 = sshll.u32 %s327_s2, 4  ;;  %s181_s23 = int_to_ptr.hbm [resolvable:$true] %s180_s23 }
   0xb   :  { %114 = vmax.xlane.f32.xlu2 %v113_v5  ;;  %55 = vadd.xlane.f32.xlu0 %v54_v6  ;;  %v116_v12 = vmax.f32 %v40_v9, %v41_v10  ;;  %v57_v13 = vadd.f32 %v41_v10, %v40_v9  ;;  %v60_v17 = vadd.f32 %v43_v15, %v42_v14  ;;  %v51_v20 = vld [vmem:[#allocation2 + $0x68] sm:$0xff]  ;;  %v52_v24 = vld [vmem:[#allocation2 + $0x70] sm:$0xff]  ;;  %v53_v25 = vld [vmem:[#allocation2 + $0x78] sm:$0xff]  ;;  %v89_v44 = vadd.s32 4294967288, %v87_v42  ;;  %s178_s20 = sshll.u32 %s284_s1, 4  ;;  %s179_s20 = int_to_ptr.vmem [resolvable:$true] %s178_s20 }
   0xc   :  { %v119_v21 = vmax.f32 %v42_v14, %v43_v15  ;;  %v131_v22 = vmax.f32 %v50_v19, %v51_v20  ;;  %v72_v23 = vadd.f32 %v51_v20, %v50_v19  ;;  %v44_v26 = vld [vmem:[#allocation2 + $0x30] sm:$0xff]  ;;  %v45_v27 = vld [vmem:[#allocation2 + $0x38] sm:$0xff]  ;;  %v75_v28 = vadd.f32 %v53_v25, %v52_v24 }
   0xd   :  { %v122_v29 = vmax.f32 %v44_v26, %v45_v27  ;;  %v63_v30 = vadd.f32 %v45_v27, %v44_v26  ;;  %v134_v31 = vmax.f32 %v52_v24, %v53_v25  ;;  %v93_v46 = vadd.s32 4294967280, %v87_v42 }
   0xe   :  { %v97_v50 = vadd.s32 4294967272, %v87_v42 }
  0x12   :  { %70 = vadd.xlane.f32.xlu1 %v69_v11 }
  0x13   :  { %117 = vmax.xlane.f32.xlu2 %v116_v12  ;;  %58 = vadd.xlane.f32.xlu0 %v57_v13 }
  0x1a   :  { %129 = vmax.xlane.f32.xlu1 %v128_v16 }
  0x1b   :  { %61 = vadd.xlane.f32.xlu2 %v60_v17  ;;  %126 = vmax.xlane.f32.xlu0 %v125_v18 }
  0x22   :  { %120 = vmax.xlane.f32.xlu1 %v119_v21 }
  0x23   :  { %132 = vmax.xlane.f32.xlu2 %v131_v22  ;;  %73 = vadd.xlane.f32.xlu0 %v72_v23 }
  0x2a   :  { %76 = vadd.xlane.f32.xlu1 %v75_v28 }
  0x2b   :  { %123 = vmax.xlane.f32.xlu2 %v122_v29  ;;  %64 = vadd.xlane.f32.xlu0 %v63_v30 }
  0x33   :  { %135 = vmax.xlane.f32.xlu0 %v134_v31 }
  0x7d   :  { %v68_v32 = vpop.xlane.xlu1 %67 }
  0x7e   :  { %v115_v33 = vpop.xlane.xlu2 %114  ;;  %v56_v34 = vpop.xlane.xlu0 %55  ;;  %v101_v48 = vperm.slane %v68_v32, %v87_v42 }
  0x7f   :  { %v88_v54 = vperm.slane %v56_v34, %v87_v42  ;;  %v145_v3 = vperm.slane %v115_v33, %v87_v42 }
  0x85   :  { %v71_v35 = vpop.xlane.xlu1 %70 }
  0x86   :  { %v118_v36 = vpop.xlane.xlu2 %117  ;;  %v59_v37 = vpop.xlane.xlu0 %58  ;;  %v102_v49 = vperm.slane %v71_v35, %v89_v44 }
  0x87   :  { %v90_v51 = vperm.slane %v59_v37, %v89_v44  ;;  %v146_v4 = vperm.slane %v118_v36, %v89_v44 }
  0x88   :  { %v103_v56 = vsel %vm91_vm0, %v102_v49, %v101_v48 }
  0x89   :  { %v92_v59 = vsel %vm91_vm0, %v90_v51, %v88_v54  ;;  %v147_v11 = vsel %vm91_vm0, %v146_v4, %v145_v3 }
  0x8d   :  { %v130_v38 = vpop.xlane.xlu1 %129 }
  0x8e   :  { %v62_v39 = vpop.xlane.xlu2 %61  ;;  %v127_v40 = vpop.xlane.xlu0 %126  ;;  %v153_v5 = vperm.slane %v130_v38, %v89_v44 }
  0x8f   :  { %v94_v53 = vperm.slane %v62_v39, %v93_v46  ;;  %v152_v6 = vperm.slane %v127_v40, %v87_v42 }
  0x91   :  { %v96_v62 = vsel %vm95_vm1, %v94_v53, %v92_v59  ;;  %v154_v12 = vsel %vm91_vm0, %v153_v5, %v152_v6 }
  0x95   :  { %v121_v43 = vpop.xlane.xlu1 %120 }
  0x96   :  { %v74_v45 = vpop.xlane.xlu0 %73  ;;  %v133_v47 = vpop.xlane.xlu2 %132  ;;  %v148_v7 = vperm.slane %v121_v43, %v93_v46 }
  0x97   :  { %v104_v52 = vperm.slane %v74_v45, %v93_v46  ;;  %v155_v8 = vperm.slane %v133_v47, %v93_v46 }
  0x98   :  { %v149_v14 = vsel %vm95_vm1, %v148_v7, %v147_v11 }
  0x99   :  { %v105_v60 = vsel %vm95_vm1, %v104_v52, %v103_v56  ;;  %v156_v15 = vsel %vm95_vm1, %v155_v8, %v154_v12 }
  0x9d   :  { %v77_v55 = vpop.xlane.xlu1 %76 }
  0x9e   :  { %v106_v57 = vperm.slane %v77_v55, %v97_v50  ;;  %v65_v58 = vpop.xlane.xlu0 %64  ;;  %v124_v1 = vpop.xlane.xlu2 %123 }
  0x9f   :  { %v98_v61 = vperm.slane %v65_v58, %v97_v50  ;;  %v150_v9 = vperm.slane %v124_v1, %v97_v50 }
  0xa0   :  { %v107_v63 = vsel %vm99_vm2, %v106_v57, %v105_v60 }
  0xa1   :  { %v100_v0 = vsel %vm99_vm2, %v98_v61, %v96_v62  ;;  %v151_v16 = vsel %vm99_vm2, %v150_v9, %v149_v14 }
  0xa2   :  { %v109_v2 = vsel %vm108_vm3, %v107_v63, %v100_v0 }
  0xa3   :  { %112 = vst.msk [vmem:[#allocation5] sm:$0x3] %vm111_vm4, %v109_v2 }
  0xa4   :  { %172 = dma.vmem_to_hbm [thread:$0]  %s168_s16, 32, %s170_s19, [#allocation4]  }
  0xa6   :  { %v136_v10 = vpop.xlane.xlu0 %135 }
  0xa7   :  { %v157_v13 = vperm.slane %v136_v10, %v97_v50 }
  0xa9   :  { %v158_v17 = vsel %vm99_vm2, %v157_v13, %v156_v15 }
  0xaa   :  { %v159_v18 = vsel %vm108_vm3, %v158_v17, %v151_v16 }
  0xab   :  { %161 = vst.msk [vmem:[#allocation6] sm:$0x3] %vm111_vm4, %v159_v18 }
  0xac   :  { %183 = dma.vmem_to_hbm [thread:$0]  %s179_s20, 32, %s181_s23, [#allocation7]  }
  0xad   :  { %276 = dma.done.wait [#allocation4], 32  }
  0xae   :  { %277 = vsyncadd [#allocation4], 4294967264 }
  0xaf   :  { %278 = dma.done.wait [#allocation7], 32  }
  0xb0   :  { %279 = vsyncadd [#allocation7], 4294967264 }
  0xb1   :  { %192 = vsyncpa [#allocation3], 1 }
  0xb2   :  { %193 = vsyncpa [#allocation4], 1 }
  0xb3   :  { %194 = vsyncpa [#allocation7], 1 }

</bundles_post_ra>
